<compile_context>
chip_gen: v7x
topology: tpu7x:2x2x1
jax: 0.10.0
libtpu: 0.0.40
codegen_flags: <defaults>
</compile_context>

<pallas_src>
import jax
import jax.numpy as jnp
from jax.experimental import pallas as pl
from jax.experimental.pallas import tpu as pltpu

PREC_EXACT = jax.lax.Precision.HIGHEST   # tiny MLP + pure-JAX reference only


# --------------------------------------------------------------------------
# Host-side helpers (run once per call under jit; weight preprocessing only)
# --------------------------------------------------------------------------
def _cores_per_chip():
    """Best-effort TensorCores-per-chip (perf heuristic only)."""
    try:
        kind = jax.devices()[0].device_kind.lower()
    except Exception:
        return 1
    # Multi-TC / megacore chips: v4, v5p, v7x.  v5e / v6e are single-TC.
    return 2 if any(t in kind for t in ("v4", "v5p", "v7")) else 1


def _pick_block_batch(B, C, HW, itemsize, cores_per_chip, cap_bytes=8 << 20):
    """Largest divisor NB of B whose (NB, C, HW) block fits under cap_bytes.

    On multi-TC chips prefer an NB that makes the grid a multiple of the core
    count (balanced 'parallel' sharding); on single-TC chips grid = 1 is fine
    and avoids paying per-step pipeline overhead twice at small batch.
    """
    per_img = C * HW * itemsize
    divs = [d for d in range(1, B + 1) if B % d == 0 and d * per_img <= cap_bytes]
    if not divs:
        return 1
    if cores_per_chip > 1:
        balanced = [d for d in divs if (B // d) % cores_per_chip == 0]
        if balanced:
            return max(balanced)
    return max(divs)


def _conv7x7_as_matrix(wsp, H, W):
    """Fold Conv2d(2, 1, 7, padding=3) weights into two dense (HW, HW) matrices
    M so conv(pooled)[n, j] == cmax[n] @ M[0] + cmean[n] @ M[1] on the flattened
    spatial axis (zero padding baked in).  Exact cross-correlation semantics."""
    HW = H * W
    idx = jnp.arange(HW, dtype=jnp.int32)
    hh = idx // W
    ww = idx % W
    dh = hh[:, None] - hh[None, :]            # h_src - h_dst, (HW, HW)
    dw = ww[:, None] - ww[None, :]
    kh = dh + 3
    kw = dw + 3
    valid = (kh >= 0) & (kh <= 6) & (kw >= 0) & (kw <= 6)
    khc = jnp.clip(kh, 0, 6)
    kwc = jnp.clip(kw, 0, 6)
    taps = wsp[0][:, khc, kwc]                # (2, HW, HW), [max, mean] channel order
    return jnp.where(valid[None], taps, 0.0).astype(jnp.float32)


# --------------------------------------------------------------------------
# Fused CBAM kernel: one grid step processes NB images entirely in VMEM.
# --------------------------------------------------------------------------
def cbam_kernel(x_ref, w1t_ref, b1_ref, w2t_ref, b2_ref, m_ref, bns_ref, out_ref):
    # Cast is a no-op for f32 inputs.
    # TODO(synk): for bf16 activations on v6e/v7x keep the gating multiplies in
    # bf16 and upcast only the pooled operands (halves VMEM/HBM traffic).
    x = x_ref[...].astype(jnp.float32)                      # (NB, C, HW)
    nb, c, hw = x.shape

    # ---- ChannelGate: avg/max pool -> ONE shared-MLP pass on stacked pools ----
    avg_p = jnp.sum(x, axis=2) * (1.0 / hw)                 # (NB, C)
    max_p = jnp.max(x, axis=2)                              # (NB, C)
    p = jnp.concatenate([avg_p, max_p], axis=0)             # (2*NB, C)

    h = jnp.maximum(
        jnp.dot(p, w1t_ref[...], preferred_element_type=jnp.float32,
                precision=PREC_EXACT) + b1_ref[...], 0.0)   # (2*NB, hid)
    att = jnp.dot(h, w2t_ref[...], preferred_element_type=jnp.float32,
                  precision=PREC_EXACT) + b2_ref[...]       # (2*NB, C)
    cscale = jax.nn.sigmoid(att[:nb] + att[nb:])            # (NB, C)
    x1 = x * cscale[:, :, None]                             # (NB, C, HW), stays in VMEM

    # ---- ChannelPool (torch order: [max, mean] over channels) ----
    cmax = jnp.max(x1, axis=1)                              # (NB, HW)
    cmean = jnp.sum(x1, axis=1) * (1.0 / c)                 # (NB, HW)
    pooled = jnp.concatenate([cmax, cmean], axis=-1)        # (NB, 2*HW), lane concat

    # ---- SpatialGate: ONE fused (NB, 2*HW) @ (2*HW, HW) matmul.
    # Default (single-pass bf16) MXU precision per perf review: the result only
    # feeds a sigmoid gate, so full f32 emulation (3-6 MXU passes) is wasted.
    # BN scale is pre-folded into m_ref; only the shift remains.
    conv = jnp.dot(pooled, m_ref[...], preferred_element_type=jnp.float32)
    sscale = jax.nn.sigmoid(conv + bns_ref[0])              # (NB, HW)

    out_ref[...] = (x1 * sscale[:, None, :]).astype(out_ref.dtype)


# --------------------------------------------------------------------------
# Wrapper
# --------------------------------------------------------------------------
def cbam_forward(x, params):
    B, C, H, W = x.shape
    HW = H * W
    hid = params["w1"].shape[0]
    NB = _pick_block_batch(B, C, HW, x.dtype.itemsize, _cores_per_chip())

    x_flat = x.reshape(B, C, HW)
    w1t = params["w1"].T.astype(jnp.float32)                # (C, hid)
    b1r = params["b1"].reshape(1, hid).astype(jnp.float32)
    w2t = params["w2"].T.astype(jnp.float32)                # (hid, C)
    b2r = params["b2"].reshape(1, C).astype(jnp.float32)

    # Conv folded into ONE dense (2*HW, HW) matrix (rows: [max-chan | mean-chan]),
    # with the inference-BatchNorm scale baked in.  Shift stays a scalar.
    # TODO(synk): for large feature maps (HW >> 1k) switch to a pltpu.roll-based
    # shifted-accumulate conv; the dense matrix is O(HW^2) and would blow VMEM.
    M = _conv7x7_as_matrix(params["wsp"].astype(jnp.float32), H, W)       # (2, HW, HW)
    bn_scale = params["bn_gamma"] / jnp.sqrt(params["bn_var"] + 1e-5)     # (1,)
    bn_shift = params["bn_beta"] - params["bn_mean"] * bn_scale           # (1,)
    M2 = (M.reshape(2 * HW, HW) * bn_scale).astype(jnp.float32)           # (2*HW, HW)
    bns = bn_shift.reshape(1).astype(jnp.float32)                         # (1,) -> SMEM

    # VMEM budget: double-buffered x + out blocks, double-buffered weights, slack.
    # Capped at 48 MiB so it stays safe on v7x's 64 MiB physical VMEM.
    blk_bytes = NB * C * HW * x.dtype.itemsize
    w_bytes = 4 * (w1t.size + b1r.size + w2t.size + b2r.size + M2.size)
    vmem_limit = int(min(max(4 * blk_bytes + 2 * w_bytes + (2 << 20), 8 << 20),
                         48 << 20))

    out_flat = pl.pallas_call(
        cbam_kernel,
        out_shape=jax.ShapeDtypeStruct((B, C, HW), x.dtype),
        grid=(B // NB,),
        in_specs=[
            pl.BlockSpec((NB, C, HW), lambda b: (b, 0, 0)),
            # Constant-index weight blocks: fetched once, stay VMEM-resident.
            # TODO(synk): single-buffer these via pipeline_mode=pl.Buffered(1)
            # once validated; saves ~|M2| of VMEM per buffer.
            pl.BlockSpec((C, hid), lambda b: (0, 0)),
            pl.BlockSpec((1, hid), lambda b: (0, 0)),
            pl.BlockSpec((hid, C), lambda b: (0, 0)),
            pl.BlockSpec((1, C), lambda b: (0, 0)),
            pl.BlockSpec((2 * HW, HW), lambda b: (0, 0)),
            pl.BlockSpec(memory_space=pltpu.MemorySpace.SMEM),   # bn shift scalar
        ],
        out_specs=pl.BlockSpec((NB, C, HW), lambda b: (b, 0, 0)),
        input_output_aliases={0: 0},      # win when the caller donates x
        compiler_params=pltpu.CompilerParams(
            dimension_semantics=("parallel",),
            vmem_limit_bytes=vmem_limit,
        ),
    )(x_flat, w1t, b1r, w2t, b2r, M2, bns)
    return out_flat.reshape(B, C, H, W)


# --------------------------------------------------------------------------
# Pure-JAX reference (mirrors the PyTorch module, eval-mode BN, full f32)
# --------------------------------------------------------------------------
def cbam_ref(x, params):
    w1, b1, w2, b2 = params["w1"], params["b1"], params["w2"], params["b2"]

    def mlp(p):  # p: (B, C)
        h = jax.nn.relu(jnp.dot(p, w1.T, precision=PREC_EXACT) + b1)
        return jnp.dot(h, w2.T, precision=PREC_EXACT) + b2

    avg_p = x.mean(axis=(2, 3))
    max_p = x.max(axis=(2, 3))
    att = mlp(avg_p) + mlp(max_p)
    cscale = jax.nn.sigmoid(att)[:, :, None, None]
    x1 = x * cscale

    cmax = x1.max(axis=1, keepdims=True)
    cmean = x1.mean(axis=1, keepdims=True)
    xc = jnp.concatenate([cmax, cmean], axis=1)                       # (B, 2, H, W)
    conv = jax.lax.conv_general_dilated(
        xc, params["wsp"], window_strides=(1, 1), padding=((3, 3), (3, 3)),
        dimension_numbers=("NCHW", "OIHW", "NCHW"), precision=PREC_EXACT)
    bn_scale = params["bn_gamma"] / jnp.sqrt(params["bn_var"] + 1e-5)
    bn_shift = params["bn_beta"] - params["bn_mean"] * bn_scale
    y = conv * bn_scale.reshape(1, 1, 1, 1) + bn_shift.reshape(1, 1, 1, 1)
    return x1 * jax.nn.sigmoid(y)


if __name__ == "__main__":
    B, C, H, W = 2, 32, 16, 16       # gate_channels=32, reduction_ratio=16 -> hidden=2
    r = 16
    hid = C // r

    key = jax.random.PRNGKey(0)
    ks = jax.random.split(key, 6)
    params = {
        "w1": jax.random.normal(ks[0], (hid, C), jnp.float32) * 0.2,   # Linear(C, C//r)
        "b1": jax.random.normal(ks[1], (hid,), jnp.float32) * 0.1,
        "w2": jax.random.normal(ks[2], (C, hid), jnp.float32) * 0.2,   # Linear(C//r, C)
        "b2": jax.random.normal(ks[3], (C,), jnp.float32) * 0.1,
        "wsp": jax.random.normal(ks[4], (1, 2, 7, 7), jnp.float32) * 0.1,  # Conv2d(2,1,7)
        "bn_gamma": jnp.full((1,), 1.2, jnp.float32),
        "bn_beta": jnp.full((1,), 0.1, jnp.float32),
        "bn_mean": jnp.full((1,), 0.05, jnp.float32),
        "bn_var": jnp.full((1,), 0.9, jnp.float32),
    }
    x = jax.random.normal(ks[5], (B, C, H, W), jnp.float32)

    # Reference first (full f32): x's buffer is donated to the kernel call below
    # so the input/output alias inside pallas_call can be honored without a copy.
    ref = cbam_ref(x, params)

    out = jax.jit(cbam_forward, donate_argnums=(0,))(x, params)
    out = jax.block_until_ready(out)

    assert out.shape == ref.shape == (B, C, H, W)
    err = float(jnp.max(jnp.abs(out - ref)))
    # Error budget: the spatial-gate conv matmul now runs at default (single-pass
    # bf16) MXU precision and only feeds a sigmoid gate; worst-case deviation vs
    # the full-f32 reference is ~1e-3, assert with ~3x margin.
    assert err < 3e-3, f"max abs error {err}"
    print("KERNEL_OK")
</pallas_src>

<mosaic_0001>
module attributes {stable_mosaic.version = 11 : i64} {
  func.func @cbam_kernel(%arg0: i32, %arg1: memref<2x32x256xf32, #tpu.memory_space<vmem>>, %arg2: memref<32x2xf32, #tpu.memory_space<vmem>>, %arg3: memref<1x2xf32, #tpu.memory_space<vmem>>, %arg4: memref<2x32xf32, #tpu.memory_space<vmem>>, %arg5: memref<1x32xf32, #tpu.memory_space<vmem>>, %arg6: memref<512x256xf32, #tpu.memory_space<vmem>>, %arg7: memref<1xf32, #tpu.memory_space<smem>>, %arg8: memref<2x32x256xf32, #tpu.memory_space<vmem>>) attributes {dimension_semantics = [#tpu.dimension_semantics<parallel>], iteration_bounds = array<i64: 1>, scalar_prefetch = 0 : i64, scratch_operands = 0 : i64, tpu.core_type = #tpu.core_type<tc>, window_params = [{transform_indices = @transform_0, window_bounds = array<i64: 2, 32, 256>}, {pipeline_mode = #tpu.pipeline_mode<synchronous>, transform_indices = @transform_1, window_bounds = array<i64: 32, 2>}, {pipeline_mode = #tpu.pipeline_mode<synchronous>, transform_indices = @transform_2, window_bounds = array<i64: 1, 2>}, {pipeline_mode = #tpu.pipeline_mode<synchronous>, transform_indices = @transform_3, window_bounds = array<i64: 2, 32>}, {pipeline_mode = #tpu.pipeline_mode<synchronous>, transform_indices = @transform_4, window_bounds = array<i64: 1, 32>}, {pipeline_mode = #tpu.pipeline_mode<synchronous>, transform_indices = @transform_5, window_bounds = array<i64: 512, 256>}, {transform_indices = @transform_6, window_bounds = array<i64: 1>}, {transform_indices = @transform_7, window_bounds = array<i64: 2, 32, 256>}]} {
    %c0 = arith.constant 0 : index
    %c0_0 = arith.constant 0 : index
    %c0_1 = arith.constant 0 : index
    %0 = vector.load %arg1[%c0, %c0_0, %c0_1] : memref<2x32x256xf32, #tpu.memory_space<vmem>>, vector<2x32x256xf32>
    %cst = arith.constant dense<0.000000e+00> : vector<2x32xf32>
    %1 = vector.multi_reduction <add>, %0, %cst [2] : vector<2x32x256xf32> to vector<2x32xf32>
    %cst_2 = arith.constant 3.906250e-03 : f32
    %2 = vector.broadcast %cst_2 : f32 to vector<2x32xf32>
    %3 = arith.mulf %1, %2 : vector<2x32xf32>
    %cst_3 = arith.constant dense<0xFF800000> : vector<2x32xf32>
    %4 = vector.multi_reduction <maximumf>, %0, %cst_3 [2] : vector<2x32x256xf32> to vector<2x32xf32>
    %5 = tpu.concatenate %3, %4 in 0 : vector<2x32xf32>, vector<2x32xf32> -> vector<4x32xf32>
    %c0_4 = arith.constant 0 : index
    %c0_5 = arith.constant 0 : index
    %6 = vector.load %arg2[%c0_4, %c0_5] : memref<32x2xf32, #tpu.memory_space<vmem>>, vector<32x2xf32>
    %cst_6 = arith.constant dense<0.000000e+00> : vector<4x2xf32>
    %7 = tpu.matmul %5, %6, %cst_6 {dimension_numbers = #tpu.dot_dimension_numbers<[1], [0], [0], [1], [0, 0, 1, 1], [], []>, precision = #tpu.contract_precision<fp32>} : vector<4x32xf32>, vector<32x2xf32>, vector<4x2xf32> -> vector<4x2xf32>
    %c0_7 = arith.constant 0 : index
    %c0_8 = arith.constant 0 : index
    %8 = vector.load %arg3[%c0_7, %c0_8] : memref<1x2xf32, #tpu.memory_space<vmem>>, vector<1x2xf32>
    %9 = vector.broadcast %8 : vector<1x2xf32> to vector<4x2xf32>
    %10 = arith.addf %7, %9 : vector<4x2xf32>
    %cst_9 = arith.constant 0.000000e+00 : f32
    %11 = vector.broadcast %cst_9 : f32 to vector<4x2xf32>
    %12 = arith.maximumf %10, %11 : vector<4x2xf32>
    %c0_10 = arith.constant 0 : index
    %c0_11 = arith.constant 0 : index
    %13 = vector.load %arg4[%c0_10, %c0_11] : memref<2x32xf32, #tpu.memory_space<vmem>>, vector<2x32xf32>
    %cst_12 = arith.constant dense<0.000000e+00> : vector<4x32xf32>
    %14 = tpu.matmul %12, %13, %cst_12 {dimension_numbers = #tpu.dot_dimension_numbers<[1], [0], [0], [1], [0, 0, 1, 1], [], []>, precision = #tpu.contract_precision<fp32>} : vector<4x2xf32>, vector<2x32xf32>, vector<4x32xf32> -> vector<4x32xf32>
    %c0_13 = arith.constant 0 : index
    %c0_14 = arith.constant 0 : index
    %15 = vector.load %arg5[%c0_13, %c0_14] : memref<1x32xf32, #tpu.memory_space<vmem>>, vector<1x32xf32>
    %16 = vector.broadcast %15 : vector<1x32xf32> to vector<4x32xf32>
    %17 = arith.addf %14, %16 : vector<4x32xf32>
    %18 = vector.extract_strided_slice %17 {offsets = [0, 0], sizes = [2, 32], strides = [1, 1]} : vector<4x32xf32> to vector<2x32xf32>
    %19 = vector.extract_strided_slice %17 {offsets = [2, 0], sizes = [2, 32], strides = [1, 1]} : vector<4x32xf32> to vector<2x32xf32>
    %20 = arith.addf %18, %19 : vector<2x32xf32>
    %21 = arith.negf %20 : vector<2x32xf32>
    %22 = math.exp %21 : vector<2x32xf32>
    %cst_15 = arith.constant 1.000000e+00 : f32
    %23 = vector.broadcast %cst_15 : f32 to vector<2x32xf32>
    %24 = arith.addf %23, %22 : vector<2x32xf32>
    %25 = arith.divf %23, %24 : vector<2x32xf32>
    %26 = vector.shape_cast %25 : vector<2x32xf32> to vector<2x32x1xf32>
    %27 = vector.broadcast %26 : vector<2x32x1xf32> to vector<2x32x256xf32>
    %28 = arith.mulf %0, %27 : vector<2x32x256xf32>
    %cst_16 = arith.constant dense<0xFF800000> : vector<2x256xf32>
    %29 = vector.multi_reduction <maximumf>, %28, %cst_16 [1] : vector<2x32x256xf32> to vector<2x256xf32>
    %cst_17 = arith.constant dense<0.000000e+00> : vector<2x256xf32>
    %30 = vector.multi_reduction <add>, %28, %cst_17 [1] : vector<2x32x256xf32> to vector<2x256xf32>
    %cst_18 = arith.constant 3.125000e-02 : f32
    %31 = vector.broadcast %cst_18 : f32 to vector<2x256xf32>
    %32 = arith.mulf %30, %31 : vector<2x256xf32>
    %33 = tpu.concatenate %29, %32 in 1 : vector<2x256xf32>, vector<2x256xf32> -> vector<2x512xf32>
    %c0_19 = arith.constant 0 : index
    %c0_20 = arith.constant 0 : index
    %34 = vector.load %arg6[%c0_19, %c0_20] : memref<512x256xf32, #tpu.memory_space<vmem>>, vector<512x256xf32>
    %cst_21 = arith.constant dense<0.000000e+00> : vector<2x256xf32>
    %35 = tpu.matmul %33, %34, %cst_21 {dimension_numbers = #tpu.dot_dimension_numbers<[1], [0], [0], [1], [0, 0, 1, 1], [], []>} : vector<2x512xf32>, vector<512x256xf32>, vector<2x256xf32> -> vector<2x256xf32>
    %c0_22 = arith.constant 0 : index
    %36 = memref.load %arg7[%c0_22] : memref<1xf32, #tpu.memory_space<smem>>
    %37 = vector.broadcast %36 : f32 to vector<2x256xf32>
    %38 = arith.addf %35, %37 : vector<2x256xf32>
    %39 = arith.negf %38 : vector<2x256xf32>
    %40 = math.exp %39 : vector<2x256xf32>
    %cst_23 = arith.constant 1.000000e+00 : f32
    %41 = vector.broadcast %cst_23 : f32 to vector<2x256xf32>
    %42 = arith.addf %41, %40 : vector<2x256xf32>
    %43 = arith.divf %41, %42 : vector<2x256xf32>
    %44 = vector.shape_cast %43 : vector<2x256xf32> to vector<2x1x256xf32>
    %45 = vector.broadcast %44 : vector<2x1x256xf32> to vector<2x32x256xf32>
    %46 = arith.mulf %28, %45 : vector<2x32x256xf32>
    %c0_24 = arith.constant 0 : index
    %c0_25 = arith.constant 0 : index
    %c0_26 = arith.constant 0 : index
    %47 = vector.load %arg8[%c0_24, %c0_25, %c0_26] : memref<2x32x256xf32, #tpu.memory_space<vmem>>, vector<2x32x256xf32>
    tpu.vector_store %arg8[%c0_24, %c0_25, %c0_26], %46 {strides = array<i32>} : memref<2x32x256xf32, #tpu.memory_space<vmem>>, vector<2x32x256xf32>,
    return
  }
  func.func @transform_0(%arg0: i32) -> (i32, i32, i32) {
    %c0_i32 = arith.constant 0 : i32
    %c0_i32_0 = arith.constant 0 : i32
    %c0_i32_1 = arith.constant 0 : i32
    return %arg0, %c0_i32, %c0_i32_0 : i32, i32, i32
  }
  func.func @transform_1(%arg0: i32) -> (i32, i32) {
    %c0_i32 = arith.constant 0 : i32
    %c0_i32_0 = arith.constant 0 : i32
    %c0_i32_1 = arith.constant 0 : i32
    return %c0_i32, %c0_i32_0 : i32, i32
  }
  func.func @transform_2(%arg0: i32) -> (i32, i32) {
    %c0_i32 = arith.constant 0 : i32
    %c0_i32_0 = arith.constant 0 : i32
    %c0_i32_1 = arith.constant 0 : i32
    return %c0_i32, %c0_i32_0 : i32, i32
  }
  func.func @transform_3(%arg0: i32) -> (i32, i32) {
    %c0_i32 = arith.constant 0 : i32
    %c0_i32_0 = arith.constant 0 : i32
    %c0_i32_1 = arith.constant 0 : i32
    return %c0_i32, %c0_i32_0 : i32, i32
  }
  func.func @transform_4(%arg0: i32) -> (i32, i32) {
    %c0_i32 = arith.constant 0 : i32
    %c0_i32_0 = arith.constant 0 : i32
    %c0_i32_1 = arith.constant 0 : i32
    return %c0_i32, %c0_i32_0 : i32, i32
  }
  func.func @transform_5(%arg0: i32) -> (i32, i32) {
    %c0_i32 = arith.constant 0 : i32
    %c0_i32_0 = arith.constant 0 : i32
    %c0_i32_1 = arith.constant 0 : i32
    return %c0_i32, %c0_i32_0 : i32, i32
  }
  func.func @transform_6(%arg0: i32) -> i32 {
    %c0_i32 = arith.constant 0 : i32
    %c0_i32_0 = arith.constant 0 : i32
    return %c0_i32 : i32
  }
  func.func @transform_7(%arg0: i32) -> (i32, i32, i32) {
    %c0_i32 = arith.constant 0 : i32
    %c0_i32_0 = arith.constant 0 : i32
    %c0_i32_1 = arith.constant 0 : i32
    return %arg0, %c0_i32, %c0_i32_0 : i32, i32, i32
  }
}

</mosaic_0001>

<bundles_post_ra>
// kernel: cbam_forward.1
= control target key start
LH: loop header
LB: loop body
LE: loop exit
PB: predicated region body
PF: predicated region fallthrough
CT: control target
= control target key end

     0   :  { %v2054_v52 = vmov 0.0|0.0   ;;  %vm2055_vm0 = vmmov 0   ;;  %v2056_v59 = vmov 0.0   ;;  %vm118_vm1 = vcmask 130112   ;;  %s2859_s0 = inlined_call_operand.vmem [shape: f32[2,32,256], index: 0, kind: input, shape index: {}, may-alias: {0,7}]   ;;  %s2860_s1 = inlined_call_operand.vmem [shape: f32[32,2], index: 1, kind: input, shape index: {}]   ;;  %s2861_s3 = inlined_call_operand.vmem [shape: f32[2,32], index: 3, kind: input, shape index: {}]   ;;  %s2862_s2 = inlined_call_operand.vmem [shape: f32[1,2], index: 2, kind: input, shape index: {}]   ;;  %s2863_s5 = inlined_call_operand.vmem [shape: f32[512,256], index: 5, kind: input, shape index: {}]   ;;  %s2864_s4 = inlined_call_operand.vmem [shape: f32[1,32], index: 4, kind: input, shape index: {}]   ;;  %s2865_s6 = inlined_call_operand.<no memory space> [shape: f32[1], index: 6, kind: input, shape index: {}]   ;;  %s2866_s7 = inlined_call_operand.vmem [shape: f32[2,32,256], index: 7, kind: output, shape index: {}, may-alias: {0,7}]  }
   0x1   :  { %v35_v0 = vld [vmem:[%s2859_s0 + $0x40] sm:$0xff]  ;;  %v36_v1 = vld [vmem:[%s2859_s0 + $0x48] sm:$0xff]  ;;  %v37_v5 = vld [vmem:[%s2859_s0 + $0x50] sm:$0xff]  ;;  %1839 = vmatprep.subr.bf16.mxu0 %v2054_v52  ;;  %1833 = vmatprep.subr.bf16.mxu1 %v2054_v52  ;;  %vm125_vm2 = vcmask 195712   ;;  %vm132_vm3 = vcmask 261312   ;;  %vm153_vm4 = vcmask 1041409  }
   0x2   :  { %v27_v2 = vld [vmem:[%s2859_s0] sm:$0xff]  ;;  %v55_v3 = vadd.f32 %v36_v1, %v35_v0  ;;  %v28_v4 = vld [vmem:[%s2859_s0 + $0x8] sm:$0xff]  ;;  %v38_v6 = vld [vmem:[%s2859_s0 + $0x58] sm:$0xff]  ;;  %v87_v27 = vmax.f32 %v35_v0, %v36_v1  ;;  %1756 = vmatprep.mubr.msk.f32.mxu0 %vm2055_vm0, %v2056_v59  ;;  %1745 = vmatprep.mubr.msk.f32.mxu1 %vm2055_vm0, %v2056_v59  ;;  %vm202_vm5 = vcmask 1043459   ;;  %vm205_vm6 = vcmask 1041408  }
   0x3   :  { %v43_v7 = vadd.f32 %v28_v4, %v27_v2  ;;  %v29_v8 = vld [vmem:[%s2859_s0 + $0x10] sm:$0xff]  ;;  %v30_v9 = vld [vmem:[%s2859_s0 + $0x18] sm:$0xff]  ;;  %v58_v10 = vadd.f32 %v38_v6, %v37_v5  ;;  %v39_v12 = vld [vmem:[%s2859_s0 + $0x60] sm:$0xff]  ;;  %v75_v25 = vmax.f32 %v27_v2, %v28_v4  ;;  %v90_v26 = vmax.f32 %v37_v5, %v38_v6 }
   0x4   :  { %56 = vadd.xlane.f32.xlu1 %v55_v3  ;;  %v46_v11 = vadd.f32 %v30_v9, %v29_v8  ;;  %v40_v13 = vld [vmem:[%s2859_s0 + $0x68] sm:$0xff]  ;;  %v31_v14 = vld [vmem:[%s2859_s0 + $0x20] sm:$0xff]  ;;  %v41_v18 = vld [vmem:[%s2859_s0 + $0x70] sm:$0xff]  ;;  %v78_v24 = vmax.f32 %v29_v8, %v30_v9  ;;  %vm218_vm7 = vcmask 261120   ;;  %vm716_vm8 = vcmask 15360  }
   0x5   :  { %44 = vadd.xlane.f32.xlu0 %v43_v7  ;;  %v32_v15 = vld [vmem:[%s2859_s0 + $0x28] sm:$0xff]  ;;  %v61_v16 = vadd.f32 %v40_v13, %v39_v12  ;;  %v42_v19 = vld [vmem:[%s2859_s0 + $0x78] sm:$0xff]  ;;  %v33_v20 = vld [vmem:[%s2859_s0 + $0x30] sm:$0xff]  ;;  %v93_v28 = vmax.f32 %v39_v12, %v40_v13  ;;  %v107_v7 = vlaneseq }
   0x6   :  { %v49_v17 = vadd.f32 %v32_v15, %v31_v14  ;;  %v34_v21 = vld [vmem:[%s2859_s0 + $0x38] sm:$0xff]  ;;  %v64_v22 = vadd.f32 %v42_v19, %v41_v18  ;;  %v81_v29 = vmax.f32 %v31_v14, %v32_v15  ;;  %v96_v30 = vmax.f32 %v41_v18, %v42_v19  ;;  %v207_v32 = vld [vmem:[%s2860_s1] sm:$0xff]  ;;  %v208_v33 = vld [vmem:[%s2860_s1 + $0x8] sm:$0xff] }
   0x7   :  { %v52_v23 = vadd.f32 %v34_v21, %v33_v20  ;;  %v84_v31 = vmax.f32 %v33_v20, %v34_v21  ;;  %v223_v34 = vand.u32 4294901760, %v207_v32  ;;  %v226_v35 = vand.u32 4294901760, %v208_v33  ;;  %v209_v38 = vld [vmem:[%s2860_s1 + $0x10] sm:$0xff]  ;;  %v210_v39 = vld [vmem:[%s2860_s1 + $0x18] sm:$0xff] }
   0x8   :  { %59 = vadd.xlane.f32.xlu1 %v58_v10  ;;  %v229_v42 = vand.u32 4294901760, %v209_v38  ;;  %v232_v43 = vand.u32 4294901760, %v210_v39  ;;  %v108_v10 = vand.u32 127, %v107_v7  ;;  %v2198_v12 = vshrl.u32 %v107_v7, 7 }
   0x9   :  { %47 = vadd.xlane.f32.xlu0 %v46_v11  ;;  %v2152_v36 = vsub.f32 %v207_v32, %v223_v34  ;;  %v2154_v37 = vsub.f32 %v208_v33, %v226_v35  ;;  %v2184_v61 = vpack.c.bf16 %v226_v35, %v223_v34 }
   0xa   :  { %v2166_v46 = vsub.f32 %v209_v38, %v229_v42  ;;  %v2168_v47 = vsub.f32 %v210_v39, %v232_v43  ;;  %v2190_v63 = vpack.c.bf16 %v232_v43, %v229_v42  ;;  %v113_v13 = vadd.s32 4294967288, %v108_v10 }
   0xb   :  { %v304_v40 = vand.u32 4294901760, %v2152_v36  ;;  %v311_v41 = vand.u32 4294901760, %v2154_v37  ;;  %v1846_v60 = vpack.c.bf16 %v2154_v37, %v2152_v36  ;;  %1835 = vmatpush3.bf16.msra.mxu1 %v2184_v61  ;;  %v120_v14 = vadd.s32 4294967280, %v108_v10 }
   0xc   :  { %62 = vadd.xlane.f32.xlu1 %v61_v16  ;;  %v318_v50 = vand.u32 4294901760, %v2166_v46  ;;  %v325_v51 = vand.u32 4294901760, %v2168_v47  ;;  %1836 = vmatprep.subr.bf16.mxu1 %v2054_v52  ;;  %v1849_v62 = vpack.c.bf16 %v2168_v47, %v2166_v46  ;;  %v127_v16 = vadd.s32 4294967272, %v108_v10 }
   0xd   :  { %50 = vadd.xlane.f32.xlu0 %v49_v17  ;;  %v305_v44 = vsub.f32 %v2152_v36, %v304_v40  ;;  %v312_v45 = vsub.f32 %v2154_v37, %v311_v41  ;;  %v2194_v0 = vpack.c.bf16 %v311_v41, %v304_v40  ;;  %v111_v18 = vsub.s32 %v108_v10, %v2198_v12  ;;  %v708_v36 = vld [vmem:[%s2861_s3] sm:$0x3] }
   0xe   :  { %v319_v54 = vsub.f32 %v2166_v46, %v318_v50  ;;  %v326_v55 = vsub.f32 %v2168_v47, %v325_v51  ;;  %v2196_v1 = vpack.c.bf16 %v325_v51, %v318_v50  ;;  %v116_v19 = vsub.s32 %v113_v13, %v2198_v12 }
   0xf   :  { %v306_v48 = vand.u32 4294901760, %v305_v44  ;;  %v313_v49 = vand.u32 4294901760, %v312_v45  ;;  %1838 = vmatpush3.bf16.msra.mxu1 %v2190_v63  ;;  %v123_v21 = vsub.s32 %v120_v14, %v2198_v12  ;;  %v721_v37 = vsel %vm205_vm6, %v708_v36, 0  ;;  %v1404_v36 = vld [vmem:[%s2863_s5 + $0x278] sm:$0xff] }
  0x10   :  { %65 = vadd.xlane.f32.xlu1 %v64_v22  ;;  %v320_v56 = vand.u32 4294901760, %v319_v54  ;;  %v327_v57 = vand.u32 4294901760, %v326_v55  ;;  %1803 = vmatprep.subr.mxu1 %v2056_v59  ;;  %v724_v46 = vand.u32 4294901760, %v721_v37 }
  0x11   :  { %53 = vadd.xlane.f32.xlu0 %v52_v23  ;;  %v1840_v53 = vpack.c.bf16 %v313_v49, %v306_v48 }
  0x12   :  { %v1843_v58 = vpack.c.bf16 %v327_v57, %v320_v56 }
  0x13   :  { %1841 = vmatpush3.bf16.msra.mxu0 %v1840_v53 }
  0x14   :  { %79 = vmax.xlane.f32.xlu1 %v78_v24  ;;  %1842 = vmatprep.subr.bf16.mxu0 %v2054_v52 }
  0x15   :  { %76 = vmax.xlane.f32.xlu0 %v75_v25 }
  0x17   :  { %1844 = vmatpush3.bf16.msra.mxu0 %v1843_v58 }
  0x18   :  { %91 = vmax.xlane.f32.xlu1 %v90_v26  ;;  %1845 = vmatprep.subr.bf16.mxu0 %v2054_v52 }
  0x19   :  { %88 = vmax.xlane.f32.xlu0 %v87_v27 }
  0x1c   :  { %94 = vmax.xlane.f32.xlu1 %v93_v28  ;;  %v130_v28 = vsub.s32 %v127_v16, %v2198_v12 }
  0x1d   :  { %82 = vmax.xlane.f32.xlu0 %v81_v29 }
  0x20   :  { %97 = vmax.xlane.f32.xlu1 %v96_v30 }
  0x21   :  { %85 = vmax.xlane.f32.xlu0 %v84_v31 }
  0x91   :  { %v57_v2 = vpop.xlane.xlu1 %56 }
  0x92   :  { %v45_v3 = vpop.xlane.xlu0 %44  ;;  %v71_v22 = vmul.f32 0.00390625, %v57_v2 }
  0x93   :  { %v67_v23 = vmul.f32 0.00390625, %v45_v3 }
  0x94   :  { %v137_v33 = vrot.slane %v71_v22, %v111_v18 }
  0x95   :  { %v60_v4 = vpop.xlane.xlu1 %59  ;;  %v112_v34 = vrot.slane %v67_v23, %v111_v18 }
  0x96   :  { %v48_v5 = vpop.xlane.xlu0 %47  ;;  %v72_v20 = vmul.f32 0.00390625, %v60_v4 }
  0x97   :  { %v68_v24 = vmul.f32 0.00390625, %v48_v5 }
  0x98   :  { %v141_v32 = vrot.slane %v72_v20, %v116_v19 }
  0x99   :  { %v63_v6 = vpop.xlane.xlu1 %62  ;;  %v117_v35 = vrot.slane %v68_v24, %v116_v19 }
  0x9a   :  { %v51_v8 = vpop.xlane.xlu0 %50  ;;  %v73_v25 = vmul.f32 0.00390625, %v63_v6  ;;  %v142_v51 = vsel %vm118_vm1, %v141_v32, %v137_v33  ;;  %v1326_v32 = vld [vmem:[%s2863_s5 + $0x8] sm:$0xff]  ;;  %v1328_v33 = vld [vmem:[%s2863_s5 + $0x18] sm:$0xff] }
  0x9b   :  { %v69_v27 = vmul.f32 0.00390625, %v51_v8  ;;  %v119_v54 = vsel %vm118_vm1, %v117_v35, %v112_v34  ;;  %v1325_v34 = vld [vmem:[%s2863_s5] sm:$0xff]  ;;  %v1869_v35 = vpack.c.bf16 %v1328_v33, %v1326_v32 }
  0x9c   :  { %v146_v38 = vrot.slane %v73_v25, %v123_v21 }
  0x9d   :  { %v66_v9 = vpop.xlane.xlu1 %65  ;;  %v124_v40 = vrot.slane %v69_v27, %v123_v21 }
  0x9e   :  { %v54_v11 = vpop.xlane.xlu0 %53  ;;  %v74_v29 = vmul.f32 0.00390625, %v66_v9  ;;  %v147_v55 = vsel %vm125_vm2, %v146_v38, %v142_v51  ;;  %v1327_v38 = vld [vmem:[%s2863_s5 + $0x10] sm:$0xff] }
  0x9f   :  { %v70_v31 = vmul.f32 0.00390625, %v54_v11  ;;  %v126_v57 = vsel %vm125_vm2, %v124_v40, %v119_v54  ;;  %v1871_v40 = vpack.c.bf16 %v1327_v38, %v1325_v34  ;;  %v1394_v54 = vld [vmem:[%s2863_s5 + $0x228] sm:$0xff]  ;;  %v1345_v34 = vld [vmem:[%s2863_s5 + $0xa0] sm:$0xff] }
  0xa0   :  { %v151_v41 = vrot.slane %v74_v29, %v130_v28  ;;  %v1409_v38 = vld [vmem:[%s2863_s5 + $0x2a0] sm:$0xff] }
  0xa1   :  { %v80_v15 = vpop.xlane.xlu1 %79  ;;  %v131_v45 = vrot.slane %v70_v31, %v130_v28 }
  0xa2   :  { %v77_v17 = vpop.xlane.xlu0 %76  ;;  %v171_v48 = vrot.slane %v80_v15, %v116_v19  ;;  %v152_v58 = vsel %vm132_vm3, %v151_v41, %v147_v55  ;;  %v1396_v55 = vld [vmem:[%s2863_s5 + $0x238] sm:$0xff] }
  0xa3   :  { %v167_v49 = vrot.slane %v77_v17, %v111_v18  ;;  %v133_v5 = vsel %vm132_vm3, %v131_v45, %v126_v57  ;;  %v1937_v57 = vpack.c.bf16 %v1396_v55, %v1394_v54  ;;  %v1415_v54 = vld [vmem:[%s2863_s5 + $0x2d0] sm:$0xff]  ;;  %v1354_v55 = vld [vmem:[%s2863_s5 + $0xe8] sm:$0xff] }
  0xa4   :  { %v154_v13 = vsel %vm153_vm4, %v152_v58, %v133_v5  ;;  %v1395_v58 = vld [vmem:[%s2863_s5 + $0x230] sm:$0xff] }
  0xa5   :  { %v92_v26 = vpop.xlane.xlu1 %91  ;;  %v172_v6 = vsel %vm118_vm1, %v171_v48, %v167_v49  ;;  %v1332_v48 = vld [vmem:[%s2863_s5 + $0x38] sm:$0xff]  ;;  %v1329_v49 = vld [vmem:[%s2863_s5 + $0x20] sm:$0xff] }
  0xa6   :  { %v89_v30 = vpop.xlane.xlu0 %88  ;;  %v190_v42 = vrot.slane %v92_v26, %v116_v19 }
  0xa7   :  { %v186_v43 = vrot.slane %v89_v30, %v111_v18 }
  0xa9   :  { %v95_v39 = vpop.xlane.xlu1 %94  ;;  %v191_v2 = vsel %vm118_vm1, %v190_v42, %v186_v43  ;;  %v1389_v42 = vld [vmem:[%s2863_s5 + $0x200] sm:$0xff]  ;;  %v1391_v43 = vld [vmem:[%s2863_s5 + $0x210] sm:$0xff] }
  0xaa   :  { %v83_v44 = vpop.xlane.xlu0 %82  ;;  %v195_v50 = vrot.slane %v95_v39, %v123_v21  ;;  %v1392_v39 = vld [vmem:[%s2863_s5 + $0x218] sm:$0xff]  ;;  %v1935_v45 = vpack.c.bf16 %v1391_v43, %v1389_v42  ;;  %v1414_v42 = vld [vmem:[%s2863_s5 + $0x2c8] sm:$0xff] }
  0xab   :  { %v176_v53 = vrot.slane %v83_v44, %v123_v21  ;;  %v1330_v44 = vld [vmem:[%s2863_s5 + $0x28] sm:$0xff]  ;;  %v1416_v43 = vld [vmem:[%s2863_s5 + $0x2d8] sm:$0xff] }
  0xac   :  { %v196_v7 = vsel %vm125_vm2, %v195_v50, %v191_v2  ;;  %v1331_v50 = vld [vmem:[%s2863_s5 + $0x30] sm:$0xff]  ;;  %v1873_v51 = vpack.c.bf16 %v1332_v48, %v1330_v44  ;;  %v1334_v2 = vld [vmem:[%s2863_s5 + $0x48] sm:$0xff] }
  0xad   :  { %v98_v56 = vpop.xlane.xlu1 %97  ;;  %v177_v9 = vsel %vm125_vm2, %v176_v53, %v172_v6  ;;  %v1875_v53 = vpack.c.bf16 %v1331_v50, %v1329_v49  ;;  %v1333_v6 = vld [vmem:[%s2863_s5 + $0x40] sm:$0xff]  ;;  %v1351_v50 = vld [vmem:[%s2863_s5 + $0xd0] sm:$0xff] }
  0xae   :  { %v200_v3 = vrot.slane %v98_v56, %v130_v28  ;;  %v86_v4 = vpop.xlane.xlu0 %85  ;;  %v1393_v56 = vld [vmem:[%s2863_s5 + $0x220] sm:$0xff] }
  0xaf   :  { %v181_v8 = vrot.slane %v86_v4, %v130_v28  ;;  %v1939_v4 = vpack.c.bf16 %v1395_v58, %v1393_v56  ;;  %v1349_v49 = vld [vmem:[%s2863_s5 + $0xc0] sm:$0xff]  ;;  %v1356_v56 = vld [vmem:[%s2863_s5 + $0xf8] sm:$0xff] }
  0xb0   :  { %v201_v10 = vsel %vm132_vm3, %v200_v3, %v196_v7  ;;  %v1336_v3 = vld [vmem:[%s2863_s5 + $0x58] sm:$0xff]  ;;  %v1335_v7 = vld [vmem:[%s2863_s5 + $0x50] sm:$0xff] }
  0xb1   :  { %v182_v11 = vsel %vm132_vm3, %v181_v8, %v177_v9  ;;  %v1877_v5 = vpack.c.bf16 %v1336_v3, %v1334_v2  ;;  %v1398_v8 = vld [vmem:[%s2863_s5 + $0x248] sm:$0xff]  ;;  %v1400_v9 = vld [vmem:[%s2863_s5 + $0x258] sm:$0xff]  ;;  %v1897_v2 = vpack.c.bf16 %v1356_v56, %v1354_v55  ;;  %v1353_v3 = vld [vmem:[%s2863_s5 + $0xe0] sm:$0xff] }
  0xb2   :  { %v203_v14 = vsel %vm202_vm5, %v201_v10, %v182_v11  ;;  %v1397_v10 = vld [vmem:[%s2863_s5 + $0x240] sm:$0xff]  ;;  %v1399_v11 = vld [vmem:[%s2863_s5 + $0x250] sm:$0xff]  ;;  %v1370_v55 = vld [vmem:[%s2863_s5 + $0x168] sm:$0xff] }
  0xb3   :  { %v206_v15 = vsel %vm205_vm6, %v154_v13, %v203_v14  ;;  %v1879_v13 = vpack.c.bf16 %v1335_v7, %v1333_v6  ;;  %v1941_v14 = vpack.c.bf16 %v1400_v9, %v1398_v8  ;;  %v1691_v6 = vld [vmem:[%s2864_s4] ss:$0 sm:$0xff]  ;;  %v1372_v56 = vld [vmem:[%s2863_s5 + $0x178] sm:$0xff] }
  0xb4   :  { %v220_v16 = vsel %vm218_vm7, %v206_v15, 0  ;;  %v1338_v15 = vld [vmem:[%s2863_s5 + $0x68] sm:$0xff] }
  0xb5   :  { %v291_v17 = vand.u32 4294901760, %v220_v16 }
  0xb7   :  { %1757 = vmatmul.mubr.f32.vlgmr.msra.gmra.mrb[0].mxu0 %v291_v17  ;;  %v292_v18 = vsub.f32 %v220_v16, %v291_v17  ;;  %v1340_v16 = vld [vmem:[%s2863_s5 + $0x78] sm:$0xff] }
  0xb8   :  { %1847 = vmatpush3.bf16.msra.mxu0 %v1846_v60  ;;  %1767 = vmatprep.mubr.msk.f32.mxu0 %vm2055_vm0, %v2056_v59 }
  0xb9   :  { %1848 = vmatprep.subr.bf16.mxu0 %v2054_v52  ;;  %v293_v19 = vand.u32 4294901760, %v292_v18 }
  0xbb   :  { %v294_v20 = vsub.f32 %v292_v18, %v293_v19 }
  0xbc   :  { %1850 = vmatpush3.bf16.msra.mxu0 %v1849_v62 }
  0xbd   :  { %1851 = vmatprep.subr.bf16.mxu0 %v2054_v52  ;;  %v295_v21 = vand.u32 4294901760, %v294_v20  ;;  %v1339_v20 = vld [vmem:[%s2863_s5 + $0x70] sm:$0xff] }
  0xbf   :  { %1746 = vmatmul.mubr.f32.vlgmr.msra.gmra.mrb[0].mxu1 %v295_v21  ;;  %1768 = vmatmul.mubr.f32.vlgmr.msra.gmra.mrb[0].mxu0 %v292_v18  ;;  %v1943_v18 = vpack.c.bf16 %v1399_v11, %v1397_v10  ;;  %v1402_v21 = vld [vmem:[%s2863_s5 + $0x268] sm:$0xff] }
  0xc0   :  { %1853 = vmatpush3.bf16.msra.mxu0 %v2184_v61  ;;  %1778 = vmatprep.mubr.msk.f32.mxu0 %vm2055_vm0, %v2056_v59 }
  0xc1   :  { %1854 = vmatprep.subr.bf16.mxu0 %v2054_v52  ;;  %1805 = vmatprep.mubr.msk.f32.mxu1 %vm2055_vm0, %v2056_v59 }
  0xc2   :  { %1804 = vmatpush3.msra.mxu1 %v724_v46 }
  0xc3   :  { %1808 = vmatprep.subr.mxu1 %v2056_v59 }
  0xc4   :  { %1856 = vmatpush3.bf16.msra.mxu0 %v2190_v63 }
  0xc5   :  { %1857 = vmatprep.subr.bf16.mxu0 %v2054_v52 }
  0xc7   :  { %1779 = vmatmul.mubr.f32.vlgmr.msra.gmra.mrb[0].mxu0 %v293_v19  ;;  %v1881_v19 = vpack.c.bf16 %v1340_v16, %v1338_v15  ;;  %v1418_v15 = vld [vmem:[%s2863_s5 + $0x2e8] sm:$0xff]  ;;  %v1420_v16 = vld [vmem:[%s2863_s5 + $0x2f8] sm:$0xff] }
  0xc8   :  { %1859 = vmatpush3.bf16.msra.mxu0 %v2194_v0  ;;  %1789 = vmatprep.mubr.msk.f32.mxu0 %vm2055_vm0, %v2056_v59 }
  0xc9   :  { %1860 = vmatprep.subr.bf16.mxu0 %v2054_v52 }
  0xcc   :  { %1862 = vmatpush3.bf16.msra.mxu0 %v2196_v1  ;;  %v801_v1 = vsub.f32 %v721_v37, %v724_v46  ;;  %v1945_v37 = vpack.c.bf16 %v1404_v36, %v1402_v21  ;;  %v1358_v36 = vld [vmem:[%s2863_s5 + $0x108] sm:$0xff] }
  0xcd   :  { %1863 = vmatprep.subr.bf16.mxu0 %v2054_v52 }
  0xce   :  { %v802_v24 = vand.u32 4294901760, %v801_v1 }
  0xcf   :  { %1790 = vmatmul.mubr.f32.vlgmr.msra.gmra.mrb[0].mxu0 %v291_v17 }
  0xd0   :  { %1865 = vmatpush3.bf16.msra.mxu0 %v2184_v61  ;;  %1800 = vmatprep.mubr.msk.f32.mxu0 %vm2055_vm0, %v2056_v59  ;;  %v1690_v61 = vld [vmem:[%s2862_s2] ss:$0 sm:$0xff]  ;;  %v803_v27 = vsub.f32 %v801_v1, %v802_v24 }
  0xd1   :  { %1866 = vmatprep.subr.bf16.mxu0 %v2054_v52 }
  0xd2   :  { %v804_v30 = vand.u32 4294901760, %v803_v27  ;;  %v1346_v27 = vld [vmem:[%s2863_s5 + $0xa8] sm:$0xff] }
  0xd4   :  { %1868 = vmatpush3.bf16.msra.mxu0 %v2190_v63 }
  0xd5   :  { %1870 = vmatprep.subr.bf16.mxu0 %v1869_v35  ;;  %v1347_v35 = vld [vmem:[%s2863_s5 + $0xb0] sm:$0xff] }
  0xd6   :  { %v1891_v44 = vpack.c.bf16 %v1347_v35, %v1345_v34  ;;  %v1427_v34 = vld [vmem:[%s2863_s5 + $0x330] sm:$0xff] }
  0xd7   :  { %1801 = vmatmul.mubr.f32.vlgmr.msra.gmra.mrb[0].mxu0 %v291_v17  ;;  %v1337_v17 = vld [vmem:[%s2863_s5 + $0x60] sm:$0xff] }
  0xd8   :  { %1872 = vmatpush1.bf16.msra.mxu0 %v1871_v40  ;;  %v1350_v40 = vld [vmem:[%s2863_s5 + $0xc8] sm:$0xff] }
  0xd9   :  { %1874 = vmatprep.subr.bf16.mxu0 %v1873_v51  ;;  %v1413_v51 = vld [vmem:[%s2863_s5 + $0x2c0] sm:$0xff] }
  0xda   :  { %v1959_v58 = vpack.c.bf16 %v1415_v54, %v1413_v51  ;;  %v1429_v51 = vld [vmem:[%s2863_s5 + $0x340] sm:$0xff] }
  0xdc   :  { %1876 = vmatpush1.bf16.msra.mxu0 %v1875_v53  ;;  %v1957_v53 = vpack.c.bf16 %v1416_v43, %v1414_v42 }
  0xdd   :  { %1878 = vmatprep.subr.bf16.mxu0 %v1877_v5 }
  0xe0   :  { %1880 = vmatpush1.bf16.msra.mxu0 %v1879_v13 }
  0xe1   :  { %1882 = vmatprep.subr.bf16.mxu0 %v1881_v19  ;;  %v1417_v19 = vld [vmem:[%s2863_s5 + $0x2e0] sm:$0xff] }
 0x192   :  { %v297_v47 = vpop.f32.mrb[0].mxu1 }
 0x193   :  { %v1747_v60 = vpop.f32.mrb[1].mxu1  ;;  %v298_v52 = vadd.f32 %v1690_v61, %v297_v47  ;;  %v1403_v47 = vld [vmem:[%s2863_s5 + $0x270] sm:$0xff]  ;;  %v1344_v61 = vld [vmem:[%s2863_s5 + $0x98] sm:$0xff] }
 0x194   :  { %v1342_v60 = vld [vmem:[%s2863_s5 + $0x88] sm:$0xff] }
 0x1aa   :  { %v703_v62 = vpop.f32.mrb[0].mxu0 }
 0x1ab   :  { %v1998_v63 = vadd.f32 %v703_v62, %v298_v52  ;;  %v1802_v0 = vpop.f32.mrb[1].mxu0  ;;  %v1883_v52 = vpack.c.bf16 %v1339_v20, %v1337_v17  ;;  %v1406_v62 = vld [vmem:[%s2863_s5 + $0x288] sm:$0xff]  ;;  %v1419_v20 = vld [vmem:[%s2863_s5 + $0x2f0] sm:$0xff] }
 0x1ac   :  { %v1963_v21 = vpack.c.bf16 %v1419_v20, %v1417_v19  ;;  %v1440_v19 = vld [vmem:[%s2863_s5 + $0x398] sm:$0xff] }
 0x1ad   :  { %v707_v22 = vmax.f32 %v1998_v63, 0.0  ;;  %v1408_v63 = vld [vmem:[%s2863_s5 + $0x298] sm:$0xff]  ;;  %1884 = vmatpush1.bf16.msra.mxu0 %v1883_v52  ;;  %v1422_v52 = vld [vmem:[%s2863_s5 + $0x308] sm:$0xff] }
 0x1af   :  { %v718_v23 = vsel %vm716_vm8, %v707_v22, 0  ;;  %v1341_v22 = vld [vmem:[%s2863_s5 + $0x80] sm:$0xff] }
 0x1b0   :  { %v789_v25 = vand.u32 4294901760, %v718_v23 }
 0x1b2   :  { %v790_v26 = vsub.f32 %v718_v23, %v789_v25  ;;  %v1343_v23 = vld [vmem:[%s2863_s5 + $0x90] sm:$0xff] }
 0x1b4   :  { %v791_v28 = vand.u32 4294901760, %v790_v26 }
 0x1b6   :  { %v792_v29 = vsub.f32 %v790_v26, %v791_v28 }
 0x1b8   :  { %v793_v31 = vand.u32 4294901760, %v792_v29  ;;  %v1410_v29 = vld [vmem:[%s2863_s5 + $0x2a8] sm:$0xff] }
 0x1ba   :  { %1806 = vmatmul.mubr.f32.vlgmr.msra.gmra.mrb[2].mxu1 %v793_v31  ;;  %v1887_v31 = vpack.c.bf16 %v1343_v23, %v1341_v22  ;;  %v1362_v23 = vld [vmem:[%s2863_s5 + $0x128] sm:$0xff] }
 0x1bb   :  { %1809 = vmatpush3.msra.mxu1 %v804_v30  ;;  %1810 = vmatprep.mubr.msk.f32.mxu1 %vm2055_vm0, %v2056_v59  ;;  %v1412_v30 = vld [vmem:[%s2863_s5 + $0x2b8] sm:$0xff] }
 0x1bc   :  { %1813 = vmatprep.subr.mxu1 %v2056_v59 }
 0x1c2   :  { %1811 = vmatmul.mubr.f32.vlgmr.msra.gmra.mrb[2].mxu1 %v789_v25 }
 0x1c3   :  { %1814 = vmatpush3.msra.mxu1 %v801_v1  ;;  %1815 = vmatprep.mubr.msk.f32.mxu1 %vm2055_vm0, %v2056_v59  ;;  %v1885_v1 = vpack.c.bf16 %v1344_v61, %v1342_v60  ;;  %v1359_v60 = vld [vmem:[%s2863_s5 + $0x110] sm:$0xff] }
 0x1c4   :  { %1818 = vmatprep.subr.mxu1 %v2056_v59 }
 0x1c5   :  { %1886 = vmatprep.subr.bf16.mxu0 %v1885_v1  ;;  %v1423_v1 = vld [vmem:[%s2863_s5 + $0x310] sm:$0xff] }
 0x1c6   :  { %1888 = vmatpush1.bf16.msra.mxu0 %v1887_v31  ;;  %v2508_v31 = vsub.s32 0, %v2198_v12 }
 0x1ca   :  { %1816 = vmatmul.mubr.f32.vlgmr.msra.gmra.mrb[2].mxu1 %v790_v26  ;;  %v1407_v26 = vld [vmem:[%s2863_s5 + $0x290] sm:$0xff] }
 0x1cb   :  { %1819 = vmatpush3.msra.mxu1 %v724_v46  ;;  %1820 = vmatprep.mubr.msk.f32.mxu1 %vm2055_vm0, %v2056_v59 }
 0x1cc   :  { %1823 = vmatprep.subr.mxu1 %v2056_v59 }
 0x1d2   :  { %1821 = vmatmul.mubr.f32.vlgmr.msra.gmra.mrb[2].mxu1 %v791_v28  ;;  %v1348_v28 = vld [vmem:[%s2863_s5 + $0xb8] sm:$0xff] }
 0x1d3   :  { %1824 = vmatpush3.msra.mxu1 %v802_v24  ;;  %1825 = vmatprep.mubr.msk.f32.mxu1 %vm2055_vm0, %v2056_v59  ;;  %v1405_v24 = vld [vmem:[%s2863_s5 + $0x280] sm:$0xff]  ;;  %v1889_v33 = vpack.c.bf16 %v1348_v28, %v1346_v27  ;;  %v1363_v27 = vld [vmem:[%s2863_s5 + $0x130] sm:$0xff] }
 0x1d4   :  { %1828 = vmatprep.subr.mxu1 %v2056_v59  ;;  %v1951_v32 = vpack.c.bf16 %v1407_v26, %v1405_v24  ;;  %v1364_v24 = vld [vmem:[%s2863_s5 + $0x138] sm:$0xff]  ;;  %v1361_v26 = vld [vmem:[%s2863_s5 + $0x120] sm:$0xff] }
 0x1d5   :  { %1890 = vmatprep.subr.bf16.mxu0 %v1889_v33  ;;  %v1907_v28 = vpack.c.bf16 %v1363_v27, %v1361_v26  ;;  %v1425_v33 = vld [vmem:[%s2863_s5 + $0x320] sm:$0xff]  ;;  %v1384_v26 = vld [vmem:[%s2863_s5 + $0x1d8] sm:$0xff] }
 0x1d6   :  { %1892 = vmatpush1.bf16.msra.mxu0 %v1891_v44  ;;  %v1971_v35 = vpack.c.bf16 %v1427_v34, %v1425_v33  ;;  %v1430_v44 = vld [vmem:[%s2863_s5 + $0x348] sm:$0xff]  ;;  %v1448_v33 = vld [vmem:[%s2863_s5 + $0x3d8] sm:$0xff]  ;;  %v1445_v34 = vld [vmem:[%s2863_s5 + $0x3c0] sm:$0xff] }
 0x1da   :  { %1826 = vmatmul.mubr.f32.vlgmr.msra.gmra.mrb[2].mxu1 %v789_v25 }
 0x1db   :  { %1829 = vmatpush3.msra.mxu1 %v724_v46  ;;  %1830 = vmatprep.mubr.msk.f32.mxu1 %vm2055_vm0, %v2056_v59  ;;  %v1390_v59 = vld [vmem:[%s2863_s5 + $0x208] sm:$0xff]  ;;  %v1401_v46 = vld [vmem:[%s2863_s5 + $0x260] sm:$0xff] }
 0x1dc   :  { %v1933_v41 = vpack.c.bf16 %v1392_v39, %v1390_v59  ;;  %v1947_v0 = vpack.c.bf16 %v1403_v47, %v1401_v46  ;;  %v1953_v59 = vpack.c.bf16 %v1412_v30, %v1410_v29  ;;  %v1411_v39 = vld [vmem:[%s2863_s5 + $0x2b0] sm:$0xff]  ;;  %v1357_v47 = vld [vmem:[%s2863_s5 + $0x100] sm:$0xff]  ;;  %v1426_v29 = vld [vmem:[%s2863_s5 + $0x328] sm:$0xff] }
 0x1dd   :  { %v1903_v61 = vpack.c.bf16 %v1359_v60, %v1357_v47  ;;  %v1428_v30 = vld [vmem:[%s2863_s5 + $0x338] sm:$0xff] }
 0x1de   :  { %1934 = vmatprep.subr.bf16.mxu1 %v1933_v41  ;;  %v1352_v41 = vld [vmem:[%s2863_s5 + $0xd8] sm:$0xff] }
 0x1df   :  { %v1893_v48 = vpack.c.bf16 %v1352_v41, %v1350_v40  ;;  %v1365_v40 = vld [vmem:[%s2863_s5 + $0x140] sm:$0xff]  ;;  %v1367_v41 = vld [vmem:[%s2863_s5 + $0x150] sm:$0xff]  ;;  %v1380_v47 = vld [vmem:[%s2863_s5 + $0x1b8] sm:$0xff] }
 0x1e0   :  { %v1911_v43 = vpack.c.bf16 %v1367_v41, %v1365_v40 }
 0x1e1   :  { %1894 = vmatprep.subr.bf16.mxu0 %v1893_v48 }
 0x1e2   :  { %1831 = vmatmul.mubr.f32.vlgmr.msra.gmra.mrb[2].mxu1 %v789_v25  ;;  %v1949_v25 = vpack.c.bf16 %v1408_v63, %v1406_v62  ;;  %v1424_v62 = vld [vmem:[%s2863_s5 + $0x318] sm:$0xff] }
 0x1e3   :  { %1936 = vmatpush1.bf16.msra.mxu1 %v1935_v45  ;;  %v1955_v45 = vpack.c.bf16 %v1411_v39, %v1409_v38  ;;  %v1965_v63 = vpack.c.bf16 %v1424_v62, %v1422_v52  ;;  %v1366_v38 = vld [vmem:[%s2863_s5 + $0x148] sm:$0xff]  ;;  %v1379_v52 = vld [vmem:[%s2863_s5 + $0x1b0] sm:$0xff] }
 0x1e4   :  { %1938 = vmatprep.subr.bf16.mxu1 %v1937_v57  ;;  %v1895_v57 = vpack.c.bf16 %v1351_v50, %v1349_v49  ;;  %v2536_v49 = vsub.s32 1, %v2198_v12 }
 0x1e6   :  { %1896 = vmatpush1.bf16.msra.mxu0 %v1895_v57  ;;  %v1913_v57 = vpack.c.bf16 %v1372_v56, %v1370_v55 }
 0x1e7   :  { %1940 = vmatpush1.bf16.msra.mxu1 %v1939_v4  ;;  %v1355_v4 = vld [vmem:[%s2863_s5 + $0xf0] sm:$0xff]  ;;  %1898 = vmatprep.subr.bf16.mxu0 %v1897_v2 }
 0x1e8   :  { %1942 = vmatprep.subr.bf16.mxu1 %v1941_v14  ;;  %v1899_v5 = vpack.c.bf16 %v1355_v4, %v1353_v3  ;;  %v1371_v2 = vld [vmem:[%s2863_s5 + $0x170] sm:$0xff]  ;;  %v1434_v4 = vld [vmem:[%s2863_s5 + $0x368] sm:$0xff] }
 0x1ea   :  { %1900 = vmatpush1.bf16.msra.mxu0 %v1899_v5  ;;  %v1436_v5 = vld [vmem:[%s2863_s5 + $0x378] sm:$0xff] }
 0x1eb   :  { %1944 = vmatpush1.bf16.msra.mxu1 %v1943_v18  ;;  %v1961_v18 = vpack.c.bf16 %v1420_v16, %v1418_v15  ;;  %v1373_v15 = vld [vmem:[%s2863_s5 + $0x180] sm:$0xff]  ;;  %v1375_v16 = vld [vmem:[%s2863_s5 + $0x190] sm:$0xff] }
 0x1ec   :  { %1946 = vmatprep.subr.bf16.mxu1 %v1945_v37  ;;  %v1360_v37 = vld [vmem:[%s2863_s5 + $0x118] sm:$0xff] }
 0x1ed   :  { %v1901_v46 = vpack.c.bf16 %v1360_v37, %v1358_v36  ;;  %v1439_v36 = vld [vmem:[%s2863_s5 + $0x390] sm:$0xff] }
 0x1ef   :  { %1948 = vmatpush1.bf16.msra.mxu1 %v1947_v0  ;;  %1902 = vmatprep.subr.bf16.mxu0 %v1901_v46  ;;  %v1421_v0 = vld [vmem:[%s2863_s5 + $0x300] sm:$0xff]  ;;  %v1378_v46 = vld [vmem:[%s2863_s5 + $0x1a8] sm:$0xff] }
 0x1f0   :  { %1950 = vmatprep.subr.bf16.mxu1 %v1949_v25  ;;  %1904 = vmatpush1.bf16.msra.mxu0 %v1903_v61  ;;  %v1967_v22 = vpack.c.bf16 %v1423_v1, %v1421_v0  ;;  %v1905_v25 = vpack.c.bf16 %v1364_v24, %v1362_v23  ;;  %v1921_v60 = vpack.c.bf16 %v1380_v47, %v1378_v46  ;;  %v1377_v61 = vld [vmem:[%s2863_s5 + $0x1a0] sm:$0xff]  ;;  %v1444_v0 = vld [vmem:[%s2863_s5 + $0x3b8] sm:$0xff]  ;;  %v1443_v23 = vld [vmem:[%s2863_s5 + $0x3b0] sm:$0xff] }
 0x1f1   :  { %v1923_v62 = vpack.c.bf16 %v1379_v52, %v1377_v61  ;;  %v2046_v47 = vld [vmem:[%s2859_s0 + $0x30] sm:$0xff]  ;;  %v2047_v61 = vld [vmem:[%s2859_s0 + $0x38] sm:$0xff] }
 0x1f2   :  { %1906 = vmatprep.subr.bf16.mxu0 %v1905_v25  ;;  %v1382_v25 = vld [vmem:[%s2863_s5 + $0x1c8] sm:$0xff] }
 0x1f3   :  { %1952 = vmatpush1.bf16.msra.mxu1 %v1951_v32  ;;  %v1969_v32 = vpack.c.bf16 %v1428_v30, %v1426_v29  ;;  %v1925_v27 = vpack.c.bf16 %v1384_v26, %v1382_v25  ;;  %v1383_v29 = vld [vmem:[%s2863_s5 + $0x1d0] sm:$0xff] }
 0x1f4   :  { %1954 = vmatprep.subr.bf16.mxu1 %v1953_v59  ;;  %1908 = vmatpush1.bf16.msra.mxu0 %v1907_v28  ;;  %v1368_v59 = vld [vmem:[%s2863_s5 + $0x158] sm:$0xff]  ;;  %v1381_v28 = vld [vmem:[%s2863_s5 + $0x1c0] sm:$0xff] }
 0x1f5   :  { %v1909_v39 = vpack.c.bf16 %v1368_v59, %v1366_v38  ;;  %v1927_v30 = vpack.c.bf16 %v1383_v29, %v1381_v28  ;;  %v1447_v38 = vld [vmem:[%s2863_s5 + $0x3d0] sm:$0xff]  ;;  %v1386_v59 = vld [vmem:[%s2863_s5 + $0x1e8] sm:$0xff] }
 0x1f6   :  { %v1991_v40 = vpack.c.bf16 %v1447_v38, %v1445_v34  ;;  %v2050_v34 = vld [vmem:[%s2859_s0 + $0x60] sm:$0xff]  ;;  %v2051_v38 = vld [vmem:[%s2859_s0 + $0x68] sm:$0xff] }
 0x1f7   :  { %1956 = vmatpush1.bf16.msra.mxu1 %v1955_v45  ;;  %v1432_v45 = vld [vmem:[%s2863_s5 + $0x358] sm:$0xff]  ;;  %1910 = vmatprep.subr.bf16.mxu0 %v1909_v39 }
 0x1f8   :  { %1958 = vmatprep.subr.bf16.mxu1 %v1957_v53  ;;  %v1973_v50 = vpack.c.bf16 %v1432_v45, %v1430_v44  ;;  %v1431_v53 = vld [vmem:[%s2863_s5 + $0x350] sm:$0xff]  ;;  %1912 = vmatpush1.bf16.msra.mxu0 %v1911_v43  ;;  %v1388_v39 = vld [vmem:[%s2863_s5 + $0x1f8] sm:$0xff]  ;;  %v1450_v44 = vld [vmem:[%s2863_s5 + $0x3e8] sm:$0xff] }
 0x1f9   :  { %v1975_v54 = vpack.c.bf16 %v1431_v53, %v1429_v51  ;;  %1914 = vmatprep.subr.bf16.mxu0 %v1913_v57  ;;  %v1929_v41 = vpack.c.bf16 %v1388_v39, %v1386_v59  ;;  %v1387_v43 = vld [vmem:[%s2863_s5 + $0x1f0] sm:$0xff]  ;;  %v1449_v51 = vld [vmem:[%s2863_s5 + $0x3e0] sm:$0xff] }
 0x1fa   :  { %v1451_v53 = vld [vmem:[%s2863_s5 + $0x3f0] sm:$0xff] }
 0x1fb   :  { %1960 = vmatpush1.bf16.msra.mxu1 %v1959_v58  ;;  %v1369_v58 = vld [vmem:[%s2863_s5 + $0x160] sm:$0xff]  ;;  %v2038_v57 = vld [vmem:[%s2859_s0 + $0x10] sm:$0xff] }
 0x1fc   :  { %1962 = vmatprep.subr.bf16.mxu1 %v1961_v18  ;;  %v1915_v3 = vpack.c.bf16 %v1371_v2, %v1369_v58  ;;  %v1438_v18 = vld [vmem:[%s2863_s5 + $0x388] sm:$0xff]  ;;  %v2039_v2 = vld [vmem:[%s2859_s0 + $0x18] sm:$0xff] }
 0x1fd   :  { %v1981_v20 = vpack.c.bf16 %v1440_v19, %v1438_v18 }
 0x1fe   :  { %1916 = vmatpush1.bf16.msra.mxu0 %v1915_v3 }
 0x1ff   :  { %1964 = vmatpush1.bf16.msra.mxu1 %v1963_v21  ;;  %v1437_v21 = vld [vmem:[%s2863_s5 + $0x380] sm:$0xff] }
 0x200   :  { %1966 = vmatprep.subr.bf16.mxu1 %v1965_v63  ;;  %v1983_v37 = vpack.c.bf16 %v1439_v36, %v1437_v21  ;;  %v1442_v63 = vld [vmem:[%s2863_s5 + $0x3a8] sm:$0xff]  ;;  %v2044_v21 = vld [vmem:[%s2859_s0 + $0x50] sm:$0xff] }
 0x201   :  { %v1985_v1 = vpack.c.bf16 %v1444_v0, %v1442_v63 }
 0x203   :  { %1968 = vmatpush1.bf16.msra.mxu1 %v1967_v22  ;;  %v1441_v22 = vld [vmem:[%s2863_s5 + $0x3a0] sm:$0xff] }
 0x204   :  { %1970 = vmatprep.subr.bf16.mxu1 %v1969_v32  ;;  %v1987_v24 = vpack.c.bf16 %v1443_v23, %v1441_v22  ;;  %v1446_v32 = vld [vmem:[%s2863_s5 + $0x3c8] sm:$0xff]  ;;  %v2048_v22 = vld [vmem:[%s2859_s0 + $0x40] sm:$0xff] }
 0x207   :  { %1972 = vmatpush1.bf16.msra.mxu1 %v1971_v35  ;;  %v1989_v35 = vpack.c.bf16 %v1448_v33, %v1446_v32 }
 0x208   :  { %1974 = vmatprep.subr.bf16.mxu1 %v1973_v50 }
 0x20b   :  { %1976 = vmatpush1.bf16.msra.mxu1 %v1975_v54  ;;  %v1995_v54 = vpack.c.bf16 %v1451_v53, %v1449_v51 }
 0x2b5   :  { %v1165_v7 = vpop.f32.mrb[2].mxu1 }
 0x2b6   :  { %v1999_v8 = vadd.f32 %v1691_v6, %v1165_v7  ;;  %v1832_v9 = vpop.f32.mrb[3].mxu1  ;;  %v1977_v7 = vpack.c.bf16 %v1436_v5, %v1434_v4  ;;  %v2040_v4 = vld [vmem:[%s2859_s0] sm:$0xff] }
 0x2b7   :  { %v1435_v9 = vld [vmem:[%s2863_s5 + $0x370] sm:$0xff] }
 0x2b8   :  { %v1170_v10 = vrot.slane %v1999_v8, 2  ;;  %1978 = vmatprep.subr.bf16.mxu1 %v1977_v7 }
 0x2ba   :  { %v1172_v11 = vadd.f32 %v1999_v8, %v1170_v10  ;;  %v1433_v8 = vld [vmem:[%s2863_s5 + $0x360] sm:$0xff] }
 0x2bb   :  { %v1979_v10 = vpack.c.bf16 %v1435_v9, %v1433_v8 }
 0x2bc   :  { %v1692_v13 = vmul.f32 -1.442695, %v1172_v11  ;;  %v1374_v11 = vld [vmem:[%s2863_s5 + $0x188] sm:$0xff] }
 0x2bd   :  { %1980 = vmatpush1.bf16.msra.mxu1 %v1979_v10  ;;  %v2042_v10 = vld [vmem:[%s2859_s0 + $0x20] sm:$0xff] }
 0x2be   :  { %2026 = vpow2.f32 %v1692_v13  ;;  %v1376_v13 = vld [vmem:[%s2863_s5 + $0x198] sm:$0xff]  ;;  %1982 = vmatprep.subr.bf16.mxu1 %v1981_v20 }
 0x2c1   :  { %1984 = vmatpush1.bf16.msra.mxu1 %v1983_v37  ;;  %v2045_v37 = vld [vmem:[%s2859_s0 + $0x58] sm:$0xff] }
 0x2c2   :  { %1986 = vmatprep.subr.bf16.mxu1 %v1985_v1 }
 0x2c5   :  { %1988 = vmatpush1.bf16.msra.mxu1 %v1987_v24  ;;  %v2049_v24 = vld [vmem:[%s2859_s0 + $0x48] sm:$0xff] }
 0x2c6   :  { %1990 = vmatprep.subr.bf16.mxu1 %v1989_v35 }
 0x2c8   :  { %v2027_v14 = vpop.eup %2026 }
 0x2c9   :  { %v1176_v17 = vadd.f32 1.0, %v2027_v14  ;;  %v1917_v14 = vpack.c.bf16 %v1376_v13, %v1374_v11  ;;  %1992 = vmatpush1.bf16.msra.mxu1 %v1991_v40  ;;  %v2043_v13 = vld [vmem:[%s2859_s0 + $0x28] sm:$0xff] }
 0x2cb   :  { %2028 = vrcp.f32 %v1176_v17  ;;  %v1919_v17 = vpack.c.bf16 %v1375_v16, %v1373_v15  ;;  %1918 = vmatprep.subr.bf16.mxu0 %v1917_v14 }
 0x2cd   :  { %1920 = vmatpush1.bf16.msra.mxu0 %v1919_v17 }
 0x2ce   :  { %1922 = vmatprep.subr.bf16.mxu0 %v1921_v60 }
 0x2d1   :  { %1924 = vmatpush1.bf16.msra.mxu0 %v1923_v62 }
 0x2d2   :  { %1926 = vmatprep.subr.bf16.mxu0 %v1925_v27 }
 0x2d5   :  { %v2029_v42 = vpop.eup %2028  ;;  %1928 = vmatpush1.bf16.msra.mxu0 %v1927_v30 }
 0x2d6   :  { %v1182_v48 = vrot.slane %v2029_v42, %v2508_v31  ;;  %v2563_v6 = vrot.slane %v2029_v42, %v2536_v49  ;;  %v1385_v42 = vld [vmem:[%s2863_s5 + $0x1e0] sm:$0xff]  ;;  %1930 = vmatprep.subr.bf16.mxu0 %v1929_v41 }
 0x2d7   :  { %v1931_v45 = vpack.c.bf16 %v1387_v43, %v1385_v42 }
 0x2d8   :  { %1188 = vbcast.lane.b32.xlu1 %v1182_v48, 264  ;;  %1184 = vbcast.lane.b32.xlu0 %v1182_v48, 256 }
 0x2d9   :  { %1932 = vmatpush1.bf16.msra.mxu0 %v1931_v45 }
 0x2dc   :  { %1203 = vbcast.lane.b32.xlu1 %v2563_v6, 256  ;;  %1192 = vbcast.lane.b32.xlu0 %v1182_v48, 272 }
 0x2e0   :  { %1207 = vbcast.lane.b32.xlu1 %v2563_v6, 264  ;;  %1196 = vbcast.lane.b32.xlu0 %v1182_v48, 280  ;;  %v1452_v48 = vld [vmem:[%s2863_s5 + $0x3f8] sm:$0xff] }
 0x2e1   :  { %v1993_v50 = vpack.c.bf16 %v1452_v48, %v1450_v44 }
 0x2e3   :  { %1994 = vmatprep.subr.bf16.mxu1 %v1993_v50 }
 0x2e4   :  { %1211 = vbcast.lane.b32.xlu1 %v2563_v6, 272  ;;  %1996 = vmatpush1.bf16.msra.mxu1 %v1995_v54 }
 0x2e8   :  { %1215 = vbcast.lane.b32.xlu1 %v2563_v6, 280  ;;  %v2041_v6 = vld [vmem:[%s2859_s0 + $0x8] sm:$0xff] }
 0x34a   :  { %v1189_v55 = vpop.permute.xlu1 %1188  ;;  %v1185_v56 = vpop.permute.xlu0 %1184 }
 0x34b   :  { %v2674_v58 = vmul.f32 %v2038_v57, %v1189_v55  ;;  %v2679_v3 = vmul.f32 %v2039_v2, %v1189_v55  ;;  %v2684_v5 = vmul.f32 %v2040_v4, %v1185_v56  ;;  %v2689_v7 = vmul.f32 %v2041_v6, %v1185_v56  ;;  %v2052_v2 = vld [vmem:[%s2859_s0 + $0x70] sm:$0xff]  ;;  %v2053_v6 = vld [vmem:[%s2859_s0 + $0x78] sm:$0xff] }
 0x34d   :  { %v1233_v15 = vmax.f32 %v2684_v5, %v2674_v58  ;;  %v1242_v16 = vmax.f32 %v2689_v7, %v2679_v3  ;;  %v1269_v17 = vadd.f32 %v2674_v58, %v2684_v5  ;;  %v1278_v18 = vadd.f32 %v2679_v3, %v2689_v7 }
 0x34e   :  { %v1204_v8 = vpop.permute.xlu1 %1203  ;;  %v1193_v9 = vpop.permute.xlu0 %1192 }
 0x34f   :  { %v2694_v11 = vmul.f32 %v2042_v10, %v1193_v9  ;;  %v2699_v14 = vmul.f32 %v2043_v13, %v1193_v9  ;;  %v2736_v23 = vmul.f32 %v2048_v22, %v1204_v8  ;;  %v2741_v25 = vmul.f32 %v2049_v24, %v1204_v8 }
 0x351   :  { %v1234_v62 = vmax.f32 %v1233_v15, %v2694_v11  ;;  %v1243_v63 = vmax.f32 %v1242_v16, %v2699_v14  ;;  %v1270_v0 = vadd.f32 %v1269_v17, %v2694_v11  ;;  %v1279_v1 = vadd.f32 %v1278_v18, %v2699_v14 }
 0x352   :  { %v1208_v19 = vpop.permute.xlu1 %1207  ;;  %v1197_v20 = vpop.permute.xlu0 %1196 }
 0x353   :  { %v2712_v36 = vmul.f32 %v2044_v21, %v1208_v19  ;;  %v2717_v46 = vmul.f32 %v2045_v37, %v1208_v19  ;;  %v2722_v60 = vmul.f32 %v2046_v47, %v1197_v20  ;;  %v2727_v52 = vmul.f32 %v2047_v61, %v1197_v20 }
 0x355   :  { %v1235_v26 = vmax.f32 %v1234_v62, %v2722_v60  ;;  %v1244_v27 = vmax.f32 %v1243_v63, %v2727_v52  ;;  %v1271_v28 = vadd.f32 %v1270_v0, %v2722_v60  ;;  %v1280_v29 = vadd.f32 %v1279_v1, %v2727_v52 }
 0x356   :  { %v1212_v30 = vpop.permute.xlu1 %1211  ;;  %v1251_v32 = vmax.f32 %v2736_v23, %v2712_v36  ;;  %v1260_v33 = vmax.f32 %v2741_v25, %v2717_v46  ;;  %v1287_v43 = vadd.f32 %v2712_v36, %v2736_v23  ;;  %v1296_v44 = vadd.f32 %v2717_v46, %v2741_v25 }
 0x357   :  { %v2754_v35 = vmul.f32 %v2050_v34, %v1212_v30  ;;  %v2759_v59 = vmul.f32 %v2051_v38, %v1212_v30  ;;  %v1236_v39 = vrot.slane %v1235_v26, 4  ;;  %v1245_v40 = vrot.slane %v1244_v27, 4 }
 0x358   :  { %v1272_v41 = vrot.slane %v1271_v28, 4  ;;  %v1281_v42 = vrot.slane %v1280_v29, 4 }
 0x359   :  { %v1252_v45 = vmax.f32 %v1251_v32, %v2754_v35  ;;  %v1261_v48 = vmax.f32 %v1260_v33, %v2759_v59  ;;  %v1237_v50 = vmax.f32 %v1235_v26, %v1236_v39  ;;  %v1246_v51 = vmax.f32 %v1244_v27, %v1245_v40 }
 0x35a   :  { %v1273_v53 = vadd.f32 %v1272_v41, %v1271_v28  ;;  %v1282_v54 = vadd.f32 %v1281_v42, %v1280_v29  ;;  %v1216_v55 = vpop.permute.xlu1 %1215  ;;  %v1288_v56 = vadd.f32 %v1287_v43, %v2754_v35  ;;  %v1297_v57 = vadd.f32 %v1296_v44, %v2759_v59 }
 0x35b   :  { %v2772_v4 = vmul.f32 %v2052_v2, %v1216_v55  ;;  %v2777_v8 = vmul.f32 %v2053_v6, %v1216_v55  ;;  %v1238_v9 = vrot.slane %v1237_v50, 2  ;;  %v1247_v10 = vrot.slane %v1246_v51, 2 }
 0x35c   :  { %v1274_v13 = vrot.slane %v1273_v53, 2  ;;  %v1283_v15 = vrot.slane %v1282_v54, 2 }
 0x35d   :  { %v1253_v16 = vmax.f32 %v1252_v45, %v2772_v4  ;;  %v1262_v17 = vmax.f32 %v1261_v48, %v2777_v8  ;;  %v1289_v18 = vadd.f32 %v1288_v56, %v2772_v4  ;;  %v1298_v19 = vadd.f32 %v1297_v57, %v2777_v8 }
 0x35e   :  { %v1275_v20 = vadd.f32 %v1274_v13, %v1273_v53  ;;  %v1284_v21 = vadd.f32 %v1283_v15, %v1282_v54  ;;  %v1239_v63 = vmax.f32 %v1237_v50, %v1238_v9  ;;  %v1248_v0 = vmax.f32 %v1246_v51, %v1247_v10 }
 0x35f   :  { %v1254_v37 = vrot.slane %v1253_v16, 4  ;;  %v1263_v47 = vrot.slane %v1262_v17, 4  ;;  %v1290_v61 = vrot.slane %v1289_v18, 4  ;;  %v1299_v62 = vrot.slane %v1298_v19, 4 }
 0x360   :  { %v1285_v27 = vrot.slane %v1284_v21, 1  ;;  %v1276_v28 = vrot.slane %v1275_v20, 1  ;;  %v1249_v34 = vrot.slane %v1248_v0, 1  ;;  %v1240_v38 = vrot.slane %v1239_v63, 1 }
 0x361   :  { %v1255_v1 = vmax.f32 %v1253_v16, %v1254_v37  ;;  %v1264_v22 = vmax.f32 %v1262_v17, %v1263_v47  ;;  %v1291_v24 = vadd.f32 %v1290_v61, %v1289_v18  ;;  %v1300_v26 = vadd.f32 %v1299_v62, %v1298_v19 }
 0x362   :  { %v1286_v43 = vadd.f32 %v1285_v27, %v1284_v21  ;;  %v1277_v44 = vadd.f32 %v1276_v28, %v1275_v20  ;;  %v1250_v53 = vmax.f32 %v1248_v0, %v1249_v34  ;;  %v1241_v54 = vmax.f32 %v1239_v63, %v1240_v38 }
 0x363   :  { %v1256_v29 = vrot.slane %v1255_v1, 2  ;;  %v1265_v30 = vrot.slane %v1264_v22, 2  ;;  %v1292_v32 = vrot.slane %v1291_v24, 2  ;;  %v1301_v33 = vrot.slane %v1300_v26, 2 }
 0x364   :  { %v1306_v6 = vmul.f32 0.03125, %v1286_v43  ;;  %v1305_v9 = vmul.f32 0.03125, %v1277_v44  ;;  %v1454_v19 = vstv %s2865_s6 }
 0x365   :  { %v1257_v39 = vmax.f32 %v1255_v1, %v1256_v29  ;;  %v1293_v40 = vadd.f32 %v1292_v32, %v1291_v24  ;;  %v1266_v41 = vmax.f32 %v1264_v22, %v1265_v30  ;;  %v1302_v42 = vadd.f32 %v1301_v33, %v1300_v26 }
 0x366   :  { %v2057_v29 = vmov 1966171168  }
 0x367   :  { %v1267_v45 = vrot.slane %v1266_v41, 1  ;;  %v1258_v48 = vrot.slane %v1257_v39, 1  ;;  %v1303_v50 = vrot.slane %v1302_v42, 1  ;;  %v1294_v51 = vrot.slane %v1293_v40, 1 }
 0x368   :  { %v1613_v30 = vunpack.c.l.s4 %v2057_v29 }
 0x369   :  { %v1268_v55 = vmax.f32 %v1266_v41, %v1267_v45  ;;  %v1259_v56 = vmax.f32 %v1257_v39, %v1258_v48  ;;  %v1304_v57 = vadd.f32 %v1303_v50, %v1302_v42  ;;  %v1295_v2 = vadd.f32 %v1294_v51, %v1293_v40 }
 0x36a   :  { %v1614_v32 = vunpack.c.0.s8 %v1613_v30 }
 0x36b   :  { %v1314_v10 = vsel %vm153_vm4, %v1268_v55, %v1250_v53  ;;  %v1313_v13 = vsel %vm153_vm4, %v1259_v56, %v1241_v54  ;;  %v1308_v15 = vmul.f32 0.03125, %v1304_v57  ;;  %v1307_v16 = vmul.f32 0.03125, %v1295_v2 }
 0x36c   :  { %1519 = vmatprep.mubr.f32.mxu0 %v1314_v10  ;;  %v1617_v34 = vsub.s32 %v1614_v32, %v2198_v12 }
 0x36d   :  { %1520 = vmatmul.mubr.f32.vlgmr.msra.gmra.mrb[2].mxu0 %v1313_v13  ;;  %v1322_v17 = vsel %vm153_vm4, %v1308_v15, %v1306_v6  ;;  %v1321_v18 = vsel %vm153_vm4, %v1307_v16, %v1305_v9 }
 0x36e   :  { %1590 = vmatprep.mubr.f32.mxu1 %v1322_v17 }
 0x36f   :  { %1591 = vmatmul.mubr.f32.vlgmr.msra.gmra.mrb[4].mxu1 %v1321_v18 }
 0x440   :  { %v1521_v20 = vpop.f32.mrb[2].mxu0 }
 0x441   :  { %v1522_v21 = vadd.f32 %v1521_v20, %v1454_v19  ;;  %v1523_v37 = vpop.f32.mrb[3].mxu0 }
 0x442   :  { %v1524_v47 = vadd.f32 %v1523_v37, %v1454_v19  ;;  %v1592_v61 = vpop.f32.mrb[4].mxu1 }
 0x443   :  { %v1593_v62 = vadd.f32 %v1592_v61, %v1522_v21  ;;  %v1594_v63 = vpop.f32.mrb[5].mxu1 }
 0x444   :  { %v1595_v0 = vadd.f32 %v1594_v63, %v1524_v47 }
 0x445   :  { %v1693_v1 = vmul.f32 -1.442695, %v1593_v62 }
 0x446   :  { %v1694_v22 = vmul.f32 -1.442695, %v1595_v0 }
 0x447   :  { %2030 = vpow2.f32 %v1693_v1 }
 0x448   :  { %2032 = vpow2.f32 %v1694_v22 }
 0x451   :  { %v2031_v24 = vpop.eup %2030 }
 0x452   :  { %v2033_v26 = vpop.eup %2032  ;;  %v1603_v27 = vadd.f32 1.0, %v2031_v24 }
 0x453   :  { %v1604_v28 = vadd.f32 1.0, %v2033_v26 }
 0x454   :  { %2034 = vrcp.f32 %v1603_v27 }
 0x455   :  { %2036 = vrcp.f32 %v1604_v28 }
 0x45e   :  { %v2035_v33 = vpop.eup %2034 }
 0x45f   :  { %v2037_v38 = vpop.eup %2036 }
 0x460   :  { %v1611_v39 = vcombine.low %v2035_v33, %v2037_v38 }
 0x462   :  { %v1618_v40 = vrot.slane %v1611_v39, %v1617_v34 }
 0x464   :  { %v1619_v41 = vcombine.high %v1618_v40, %v1618_v40  ;;  %v1626_v42 = vrot.slane %v1618_v40, %v1617_v34 }
 0x466   :  { %v1633_v43 = vrot.slane %v1619_v41, %v1617_v34  ;;  %v1637_v44 = vrot.slane %v1626_v42, %v2508_v31  ;;  %v1641_v45 = vrot.slane %v1626_v42, %v2536_v49 }
 0x468   :  { %v1645_v48 = vrot.slane %v1633_v43, %v2508_v31  ;;  %v1649_v50 = vrot.slane %v1633_v43, %v2536_v49  ;;  %v1654_v51 = vmul.f32 %v1637_v44, %v2684_v5  ;;  %v1655_v53 = vmul.f32 %v1641_v45, %v2689_v7 }
 0x469   :  { %v1656_v12 = vmul.f32 %v1637_v44, %v2674_v58  ;;  %v1657_v54 = vmul.f32 %v1641_v45, %v2679_v3  ;;  %v1658_v55 = vmul.f32 %v1637_v44, %v2694_v11  ;;  %v1659_v56 = vmul.f32 %v1641_v45, %v2699_v14 }
 0x46a   :  { %v1660_v57 = vmul.f32 %v1637_v44, %v2722_v60  ;;  %v1661_v2 = vmul.f32 %v1641_v45, %v2727_v52  ;;  %v1662_v31 = vmul.f32 %v1645_v48, %v2736_v23  ;;  %v1663_v49 = vmul.f32 %v1649_v50, %v2741_v25  ;;  %1670 = vst [vmem:[%s2866_s7] sm:$0xff] %v1654_v51 }
 0x46b   :  { %1671 = vst [vmem:[%s2866_s7 + $0x8] sm:$0xff] %v1655_v53  ;;  %v1664_v58 = vmul.f32 %v1645_v48, %v2712_v36  ;;  %v1665_v3 = vmul.f32 %v1649_v50, %v2717_v46  ;;  %v1666_v5 = vmul.f32 %v1645_v48, %v2754_v35  ;;  %v1667_v7 = vmul.f32 %v1649_v50, %v2759_v59 }
 0x46c   :  { %1672 = vst [vmem:[%s2866_s7 + $0x10] sm:$0xff] %v1656_v12  ;;  %1673 = vst [vmem:[%s2866_s7 + $0x18] sm:$0xff] %v1657_v54  ;;  %v1668_v11 = vmul.f32 %v1645_v48, %v2772_v4  ;;  %v1669_v14 = vmul.f32 %v1649_v50, %v2777_v8 }
 0x46d   :  { %1674 = vst [vmem:[%s2866_s7 + $0x20] sm:$0xff] %v1658_v55  ;;  %1675 = vst [vmem:[%s2866_s7 + $0x28] sm:$0xff] %v1659_v56 }
 0x46e   :  { %1676 = vst [vmem:[%s2866_s7 + $0x30] sm:$0xff] %v1660_v57  ;;  %1677 = vst [vmem:[%s2866_s7 + $0x38] sm:$0xff] %v1661_v2 }
 0x46f   :  { %1678 = vst [vmem:[%s2866_s7 + $0x40] sm:$0xff] %v1662_v31  ;;  %1679 = vst [vmem:[%s2866_s7 + $0x48] sm:$0xff] %v1663_v49 }
 0x470   :  { %1680 = vst [vmem:[%s2866_s7 + $0x50] sm:$0xff] %v1664_v58  ;;  %1681 = vst [vmem:[%s2866_s7 + $0x58] sm:$0xff] %v1665_v3 }
 0x471   :  { %1682 = vst [vmem:[%s2866_s7 + $0x60] sm:$0xff] %v1666_v5  ;;  %1683 = vst [vmem:[%s2866_s7 + $0x68] sm:$0xff] %v1667_v7 }
 0x472   :  { %1684 = vst [vmem:[%s2866_s7 + $0x70] sm:$0xff] %v1668_v11  ;;  %1685 = vst [vmem:[%s2866_s7 + $0x78] sm:$0xff] %v1669_v14 }

</bundles_post_ra>
